<compile_context>
chip_gen: v6e
topology: v6e:2x2x1
jax: 0.10.0
libtpu: 0.0.40
codegen_flags: <defaults>
</compile_context>

<pallas_src>
import functools

import jax
import jax.numpy as jnp
from jax.experimental import pallas as pl
from jax.experimental.pallas import tpu as pltpu

LANE = 128  # lane width; hidden/output dims are zero-padded to this


def _round_up(n, m):
    return (n + m - 1) // m * m


def _pick_tile(n, target):
    """Batch-tile rows: large for DMA efficiency, >=2 grid steps when the
    batch allows (v7x megacore), bounded remainder-padding waste; always a
    multiple of 16 (bf16 sublane pack)."""
    n16 = _round_up(n, 16)
    tile = min(_round_up(target, 16), n16)
    if n16 >= 32:                                   # keep >= 2 grid steps
        tile = min(tile, _round_up(pl.cdiv(n16, 2), 16))
    while tile > 16 and _round_up(n, tile) - n > max(tile // 8, n // 8):
        tile -= 16                                  # cap padding waste
    return max(tile, 16)


def _default_bf16_tanh():
    """bf16 tanh only on chips with a bf16 EUP (v6e / v7x); f32 elsewhere."""
    try:
        kind = jax.devices()[0].device_kind.lower()
    except Exception:
        return False
    return not any(v in kind for v in ("v2", "v3", "v4", "v5"))


# -----------------------------------------------------------------------------
# Kernel: one batch tile of the whole forward pass (BN already folded in).
#   x_ref  : (tile_n, k0)   bf16  natural-width input rows (K-padded to 16)
#   w0_ref : (k0, LANE)     bf16  BN-folded first Linear weight, col-padded
#   w_ref  : (2, LANE, LANE)bf16  zero-padded [w1 | w2]
#   v_ref  : (8, LANE)      f32   rows = [b0', b1, b2, 0, ...]
#   o_ref  : (tile_n, act_dim) f32
# -----------------------------------------------------------------------------
def policy_kernel(x_ref, w0_ref, w_ref, v_ref, o_ref, *, act_dim, bf16_tanh):
    vec = v_ref[...]                                   # f32 (8, LANE)
    b0, b1, b2 = vec[0:1, :], vec[1:2, :], vec[2:3, :]

    def act(h):
        # v6e/v7x: bf16 EUP path; v5e: stay f32, cast afterwards for the MXU.
        if bf16_tanh:
            return jnp.tanh(h.astype(jnp.bfloat16))
        return jnp.tanh(h).astype(jnp.bfloat16)

    # fc0 (+ folded BatchNorm) + tanh — K = k0, bf16 operands, f32 accumulate.
    h = jnp.dot(x_ref[...], w0_ref[...], preferred_element_type=jnp.float32)
    h = act(h + b0)

    # fc1 + tanh
    h = jnp.dot(h, w_ref[0], preferred_element_type=jnp.float32)
    h = act(h + b1)

    # fc2 (no nonlinearity); padded lanes beyond act_dim are exactly zero.
    y = jnp.dot(h, w_ref[1], preferred_element_type=jnp.float32) + b2
    o_ref[...] = y[:, :act_dim].astype(o_ref.dtype)


# -----------------------------------------------------------------------------
# Host-side packing (static parts) / wrapper
# -----------------------------------------------------------------------------
def pack_params(params):
    """Pack the STATIC parts: fc1/fc2 weights into one bf16 slab and b1/b2
    into an (8, LANE) f32 block.  Row 0 of the vector block is filled per call
    with the BN-folded first-layer bias."""
    h0, h1 = params["w1"].shape
    _, act_dim = params["w2"].shape
    assert max(params["w0"].shape[0], h0, h1, act_dim) <= LANE

    w = jnp.zeros((2, LANE, LANE), jnp.float32)
    w = w.at[0, :h0, :h1].set(params["w1"])
    w = w.at[1, :h1, :act_dim].set(params["w2"])

    vec = jnp.zeros((8, LANE), jnp.float32)
    vec = vec.at[1, :h1].set(params["b1"])
    vec = vec.at[2, :act_dim].set(params["b2"])
    return w.astype(jnp.bfloat16), vec


@functools.partial(jax.jit,
                   static_argnames=("act_dim", "tile_target", "bf16_tanh"))
def policy_forward(x, params, w_slab, vec_base, *, act_dim, tile_target=512,
                   bf16_tanh=False):
    """x: (n, obs_dim) f32.  Returns (n, act_dim) f32."""
    n, obs_dim = x.shape
    h0 = params["w0"].shape[1]
    eps = 1e-5

    # Training-mode BatchNorm1d statistics over the FULL real batch (f32,
    # biased variance), folded into the first Linear.  Fold in f32, THEN cast
    # the weight to bf16; the bias stays f32.
    mean = jnp.mean(x, axis=0)
    var = jnp.mean((x - mean) ** 2, axis=0)
    scale = params["gamma"] * jax.lax.rsqrt(var + eps)
    shift = params["beta"] - mean * scale

    k0 = _round_up(obs_dim, 16)                      # bf16 sublane pack
    w0_fold = (jnp.zeros((k0, LANE), jnp.float32)
               .at[:obs_dim, :h0].set(scale[:, None] * params["w0"])
               .astype(jnp.bfloat16))
    b0_fold = shift @ params["w0"] + params["b0"]    # f32
    vec = vec_base.at[0, :h0].set(b0_fold)

    # Row-pad to a whole number of batch tiles; features stay natural width
    # (bf16), so no 128-lane f32 input slab is ever written to HBM.
    tile_n = _pick_tile(n, tile_target)
    n_pad = _round_up(n, tile_n)
    xp = (jnp.zeros((n_pad, k0), jnp.bfloat16)
          .at[:n, :obs_dim].set(x.astype(jnp.bfloat16)))

    out = pl.pallas_call(
        functools.partial(policy_kernel, act_dim=act_dim,
                          bf16_tanh=bf16_tanh),
        out_shape=jax.ShapeDtypeStruct((n_pad, act_dim), jnp.float32),
        grid_spec=pltpu.PrefetchScalarGridSpec(
            num_scalar_prefetch=0,
            grid=(n_pad // tile_n,),
            in_specs=[
                pl.BlockSpec((tile_n, k0), lambda i: (i, 0)),
                # Constant index_maps: parameters DMA'd once, VMEM-resident.
                pl.BlockSpec((k0, LANE), lambda i: (0, 0)),
                pl.BlockSpec((2, LANE, LANE), lambda i: (0, 0, 0)),
                pl.BlockSpec((8, LANE), lambda i: (0, 0)),
            ],
            out_specs=pl.BlockSpec((tile_n, act_dim), lambda i: (i, 0)),
        ),
        compiler_params=pltpu.CompilerParams(
            dimension_semantics=("parallel",)),
    )(xp, w0_fold, w_slab, vec)
    return out[:n]


# -----------------------------------------------------------------------------
# Deterministic parameter construction (matches the module's shapes) + ref.
# -----------------------------------------------------------------------------
def init_params(key, obs_dim, act_dim, hidden_sizes=(64, 64)):
    layer_sizes = (obs_dim,) + tuple(hidden_sizes) + (act_dim,)
    params = {
        "gamma": jnp.ones((obs_dim,), jnp.float32),
        "beta": jnp.zeros((obs_dim,), jnp.float32),
    }
    for i in range(len(layer_sizes) - 1):
        fan_in, fan_out = layer_sizes[i], layer_sizes[i + 1]
        key, kw, kb = jax.random.split(key, 3)
        bound = 1.0 / jnp.sqrt(fan_in)
        # Stored as (in, out): kernel does h @ W  (== PyTorch h @ weight.T)
        params[f"w{i}"] = jax.random.uniform(
            kw, (fan_in, fan_out), jnp.float32, -bound, bound)
        params[f"b{i}"] = jax.random.uniform(
            kb, (fan_out,), jnp.float32, -bound, bound)
    return params


def reference_forward(x, params):
    """Plain-JAX f32 reference of the PyTorch module's forward."""
    eps = 1e-5
    mean = jnp.mean(x, axis=0)
    var = jnp.mean((x - mean) ** 2, axis=0)
    out = (x - mean) / jnp.sqrt(var + eps) * params["gamma"] + params["beta"]
    out = jnp.tanh(out @ params["w0"] + params["b0"])
    out = jnp.tanh(out @ params["w1"] + params["b1"])
    return out @ params["w2"] + params["b2"]


if __name__ == "__main__":
    obs_dim, act_dim = 16, 8
    batch = 200  # > one tile: exercises the batch grid + remainder padding

    key = jax.random.PRNGKey(0)
    key, kx = jax.random.split(key)
    x = jax.random.normal(kx, (batch, obs_dim), jnp.float32)
    params = init_params(key, obs_dim, act_dim, hidden_sizes=(64, 64))
    w_slab, vec_base = pack_params(params)

    y = policy_forward(x, params, w_slab, vec_base, act_dim=act_dim,
                       bf16_tanh=_default_bf16_tanh())
    jax.block_until_ready(y)

    y_ref = reference_forward(x, params)
    assert y.shape == (batch, act_dim)
    # bf16 matmul operands -> relaxed tolerance vs. the pure-f32 reference.
    assert jnp.allclose(y, y_ref, atol=2e-2, rtol=2e-2), float(
        jnp.max(jnp.abs(y - y_ref)))
    print("KERNEL_OK")
</pallas_src>

<mosaic_0001>
module attributes {stable_mosaic.version = 11 : i64} {
  func.func @policy_kernel(%arg0: i32, %arg1: memref<112x16xbf16, #tpu.memory_space<vmem>>, %arg2: memref<16x128xbf16, #tpu.memory_space<vmem>>, %arg3: memref<2x128x128xbf16, #tpu.memory_space<vmem>>, %arg4: memref<8x128xf32, #tpu.memory_space<vmem>>, %arg5: memref<112x8xf32, #tpu.memory_space<vmem>>) attributes {dimension_semantics = [#tpu.dimension_semantics<parallel>], iteration_bounds = array<i64: 2>, scalar_prefetch = 0 : i64, scratch_operands = 0 : i64, tpu.core_type = #tpu.core_type<tc>, window_params = [{transform_indices = @transform_0, window_bounds = array<i64: 112, 16>}, {pipeline_mode = #tpu.pipeline_mode<synchronous>, transform_indices = @transform_1, window_bounds = array<i64: 16, 128>}, {pipeline_mode = #tpu.pipeline_mode<synchronous>, transform_indices = @transform_2, window_bounds = array<i64: 2, 128, 128>}, {pipeline_mode = #tpu.pipeline_mode<synchronous>, transform_indices = @transform_3, window_bounds = array<i64: 8, 128>}, {transform_indices = @transform_4, window_bounds = array<i64: 112, 8>}]} {
    %c0 = arith.constant 0 : index
    %c0_0 = arith.constant 0 : index
    %0 = vector.load %arg4[%c0, %c0_0] : memref<8x128xf32, #tpu.memory_space<vmem>>, vector<8x128xf32>
    %1 = vector.extract_strided_slice %0 {offsets = [0, 0], sizes = [1, 128], strides = [1, 1]} : vector<8x128xf32> to vector<1x128xf32>
    %2 = vector.extract_strided_slice %0 {offsets = [1, 0], sizes = [1, 128], strides = [1, 1]} : vector<8x128xf32> to vector<1x128xf32>
    %3 = vector.extract_strided_slice %0 {offsets = [2, 0], sizes = [1, 128], strides = [1, 1]} : vector<8x128xf32> to vector<1x128xf32>
    %c0_1 = arith.constant 0 : index
    %c0_2 = arith.constant 0 : index
    %4 = vector.load %arg1[%c0_1, %c0_2] : memref<112x16xbf16, #tpu.memory_space<vmem>>, vector<112x16xbf16>
    %c0_3 = arith.constant 0 : index
    %c0_4 = arith.constant 0 : index
    %5 = vector.load %arg2[%c0_3, %c0_4] : memref<16x128xbf16, #tpu.memory_space<vmem>>, vector<16x128xbf16>
    %cst = arith.constant dense<0.000000e+00> : vector<112x128xf32>
    %6 = tpu.matmul %4, %5, %cst {dimension_numbers = #tpu.dot_dimension_numbers<[1], [0], [0], [1], [0, 0, 1, 1], [], []>} : vector<112x16xbf16>, vector<16x128xbf16>, vector<112x128xf32> -> vector<112x128xf32>
    %7 = vector.broadcast %1 : vector<1x128xf32> to vector<112x128xf32>
    %8 = arith.addf %6, %7 : vector<112x128xf32>
    %9 = arith.truncf %8 : vector<112x128xf32> to vector<112x128xbf16>
    %10 = math.tanh %9 : vector<112x128xbf16>
    %c0_5 = arith.constant 0 : index
    %c0_6 = arith.constant 0 : index
    %c0_7 = arith.constant 0 : index
    %11 = vector.load %arg3[%c0_5, %c0_6, %c0_7] : memref<2x128x128xbf16, #tpu.memory_space<vmem>>, vector<1x128x128xbf16>
    %12 = vector.shape_cast %11 : vector<1x128x128xbf16> to vector<128x128xbf16>
    %cst_8 = arith.constant dense<0.000000e+00> : vector<112x128xf32>
    %13 = tpu.matmul %10, %12, %cst_8 {dimension_numbers = #tpu.dot_dimension_numbers<[1], [0], [0], [1], [0, 0, 1, 1], [], []>} : vector<112x128xbf16>, vector<128x128xbf16>, vector<112x128xf32> -> vector<112x128xf32>
    %14 = vector.broadcast %2 : vector<1x128xf32> to vector<112x128xf32>
    %15 = arith.addf %13, %14 : vector<112x128xf32>
    %16 = arith.truncf %15 : vector<112x128xf32> to vector<112x128xbf16>
    %17 = math.tanh %16 : vector<112x128xbf16>
    %c1 = arith.constant 1 : index
    %c0_9 = arith.constant 0 : index
    %c0_10 = arith.constant 0 : index
    %18 = vector.load %arg3[%c1, %c0_9, %c0_10] : memref<2x128x128xbf16, #tpu.memory_space<vmem>>, vector<1x128x128xbf16>
    %19 = vector.shape_cast %18 : vector<1x128x128xbf16> to vector<128x128xbf16>
    %cst_11 = arith.constant dense<0.000000e+00> : vector<112x128xf32>
    %20 = tpu.matmul %17, %19, %cst_11 {dimension_numbers = #tpu.dot_dimension_numbers<[1], [0], [0], [1], [0, 0, 1, 1], [], []>} : vector<112x128xbf16>, vector<128x128xbf16>, vector<112x128xf32> -> vector<112x128xf32>
    %21 = vector.broadcast %3 : vector<1x128xf32> to vector<112x128xf32>
    %22 = arith.addf %20, %21 : vector<112x128xf32>
    %23 = vector.extract_strided_slice %22 {offsets = [0, 0], sizes = [112, 8], strides = [1, 1]} : vector<112x128xf32> to vector<112x8xf32>
    %c0_12 = arith.constant 0 : index
    %c0_13 = arith.constant 0 : index
    %24 = vector.load %arg5[%c0_12, %c0_13] : memref<112x8xf32, #tpu.memory_space<vmem>>, vector<112x8xf32>
    tpu.vector_store %arg5[%c0_12, %c0_13], %23 {strides = array<i32>} : memref<112x8xf32, #tpu.memory_space<vmem>>, vector<112x8xf32>,
    return
  }
  func.func @transform_0(%arg0: i32) -> (i32, i32) {
    %c0_i32 = arith.constant 0 : i32
    %c0_i32_0 = arith.constant 0 : i32
    return %arg0, %c0_i32 : i32, i32
  }
  func.func @transform_1(%arg0: i32) -> (i32, i32) {
    %c0_i32 = arith.constant 0 : i32
    %c0_i32_0 = arith.constant 0 : i32
    %c0_i32_1 = arith.constant 0 : i32
    return %c0_i32, %c0_i32_0 : i32, i32
  }
  func.func @transform_2(%arg0: i32) -> (i32, i32, i32) {
    %c0_i32 = arith.constant 0 : i32
    %c0_i32_0 = arith.constant 0 : i32
    %c0_i32_1 = arith.constant 0 : i32
    %c0_i32_2 = arith.constant 0 : i32
    return %c0_i32, %c0_i32_0, %c0_i32_1 : i32, i32, i32
  }
  func.func @transform_3(%arg0: i32) -> (i32, i32) {
    %c0_i32 = arith.constant 0 : i32
    %c0_i32_0 = arith.constant 0 : i32
    %c0_i32_1 = arith.constant 0 : i32
    return %c0_i32, %c0_i32_0 : i32, i32
  }
  func.func @transform_4(%arg0: i32) -> (i32, i32) {
    %c0_i32 = arith.constant 0 : i32
    %c0_i32_0 = arith.constant 0 : i32
    return %arg0, %c0_i32 : i32, i32
  }
}

</mosaic_0001>

<bundles_post_ra>
// kernel: policy_forward.1
= control target key start
LH: loop header
LB: loop body
LE: loop exit
PB: predicated region body
PF: predicated region fallthrough
CT: control target
= control target key end

     0   :  { %s1100_s15 = smov 0   ;;  %s1314_s0 = inlined_call_operand.vmem [shape: bf16[224,16], index: 0, kind: input, shape index: {}]   ;;  %s1315_s1 = inlined_call_operand.vmem [shape: bf16[16,128], index: 1, kind: input, shape index: {}]   ;;  %s1316_s2 = inlined_call_operand.vmem [shape: bf16[2,128,128], index: 2, kind: input, shape index: {}]   ;;  %s1317_s3 = inlined_call_operand.vmem [shape: f32[8,128], index: 3, kind: input, shape index: {}]   ;;  %s1318_s4 = inlined_call_operand.vmem [shape: f32[224,8], index: 4, kind: output, shape index: {}]  }
   0x1 LB: > { %s789_s16 = sadd.s32 4294967295, %s1071_s15   ;;  %p793_p0 = scmp.ge.s32.totalorder %s1071_s15, 1  ;;  %s1071_s15 = sphi %s1100_s15, %s14_s15  }
   0x2   : > { %p163_p1 = scmp.lt.s32.totalorder %s1071_s15, 3 }
   0x4   : > { %p164_p2 = pnand %p793_p0, %p163_p1 }
   0x5   : > { %s189_s19 = smul.u32 (!%p164_p2), 14, %s789_s16 }
   0x6   : > { %167 = sbr.rel (%p164_p2) target bundleno = 696 (0x2b8), region = 36 }
   0x7   : > { %p190_p3 = scmp.lt.s32.totalorder (!%p164_p2), %s189_s19, 27 }
   0xb   : > { %v1013_v0 = vld [vmem:[%s1315_s1] sm:$0xff]   ;;  %v1073_v1 = vmov 0.0   ;;  %vm1074_vm0 = vmmov 0   ;;  %s1320_s19 = smov (!%p190_p3, %s189_s19), 27  ;;  %vm264_vm1 = vcmask 130048   ;;  %v1021_v3 = vld [vmem:[%s1316_s2 + $0x38] sm:$0xff]   ;;  %v219_v19 = vlaneseq }
   0xc   : > { %883 = vmatprep.subr.bf16.mxu0 %v1073_v1  ;;  %1001 = vmatprep.subr.bf16.mxu1 %v1073_v1  ;;  %s794_s20 = sshll.u32 %s1320_s19, 2  ;;  %v1022_v5 = vld [vmem:[%s1316_s2 + $0x30] sm:$0xff]   ;;  %v1023_v11 = vld [vmem:[%s1316_s2 + $0x28] sm:$0xff]   ;;  %v1024_v12 = vld [vmem:[%s1316_s2 + $0x20] sm:$0xff]   ;;  %s795_s8 = sshll.u32 %s1320_s19, 3  ;;  %vm718_vm2 = vcmask 64512  }
   0xd   : > { %884 = vmatpush3.bf16.msra.mxu0 %v1013_v0  ;;  %885 = vmatprep.mubr.msk.bf16.mxu0 %vm1074_vm0, %v1073_v1  ;;  %s193_s23 = scalar_lea.vmem %s1314_s0, %s794_s20  ;;  %v1025_v13 = vld [vmem:[%s1316_s2 + $0x18] sm:$0xff]   ;;  %v1026_v14 = vld [vmem:[%s1316_s2 + $0x10] sm:$0xff]   ;;  %v1027_v15 = vld [vmem:[%s1316_s2 + $0x8] sm:$0xff]   ;;  %v1185_v20 = vshrl.u32 %v219_v19, 7  ;;  %s1281_s11 = scalar_lea.vmem %s1318_s4, %s795_s8 }
   0xe   : > { %1002 = vmatpush3.bf16.msra.mxu1 %v1013_v0  ;;  %901 = vmatprep.mubr.msk.bf16.mxu1 %vm1074_vm0, %v1073_v1  ;;  %v1014_v2 = vld [vmem:[%s193_s23] sm:$0xff]   ;;  %v1015_v6 = vld [vmem:[%s193_s23 + $0x8] sm:$0xff]   ;;  %v1016_v8 = vld [vmem:[%s193_s23 + $0x10] sm:$0xff]  }
   0xf   : > { %913 = vmatprep.subr.bf16.mxu1 %v1073_v1  ;;  %957 = vmatprep.subr.bf16.mxu0 %v1073_v1  ;;  %v1018_v4 = vld [vmem:[%s193_s23 + $0x20] sm:$0xff]   ;;  %v1019_v7 = vld [vmem:[%s193_s23 + $0x28] sm:$0xff]   ;;  %v1020_v9 = vld [vmem:[%s193_s23 + $0x30] sm:$0xff]   ;;  %v221_v21 = vsub.s32 0, %v1185_v20 }
  0x10   : > { %886 = vmatmul.mubr.msk.bf16.vlgmr.msra.gmra.mxu0 %vm264_vm1, %v1014_v2  ;;  %v1017_v10 = vld [vmem:[%s193_s23 + $0x18] sm:$0xff]   ;;  %v1028_v16 = vld [vmem:[%s1316_s2] sm:$0xff]   ;;  %v1030_v18 = vld [vmem:[%s1316_s2 + $0x70] sm:$0xff]  }
  0x11   : > { %889 = vmatprep.mubr.msk.bf16.mxu0 %vm1074_vm0, %v1073_v1  ;;  %902 = vmatmul.mubr.msk.bf16.vlgmr.msra.gmra.mxu1 %vm264_vm1, %v1018_v4  ;;  %v1029_v17 = vld [vmem:[%s1316_s2 + $0x78] sm:$0xff]   ;;  %v1191_v22 = vld [vmem:[%s1317_s3] sm:$0xff] }
  0x12   : > { %905 = vmatprep.mubr.msk.bf16.mxu1 %vm1074_vm0, %v1073_v1  ;;  %914 = vmatpush3.bf16.msra.mxu1 %v1021_v3  ;;  %v1194_v24 = vrot.slane %v1191_v22, %v221_v21  ;;  %v1033_v19 = vld [vmem:[%s1316_s2 + $0x58] sm:$0xff]   ;;  %v1034_v21 = vld [vmem:[%s1316_s2 + $0x50] sm:$0xff]  }
  0x13   : > { %915 = vmatprep.subr.bf16.mxu1 %v1073_v1  ;;  %958 = vmatpush3.bf16.msra.mxu0 %v1029_v17  ;;  %v1031_v17 = vld [vmem:[%s1316_s2 + $0x68] sm:$0xff]  }
  0x14   : > { %959 = vmatprep.subr.bf16.mxu0 %v1073_v1 }
  0x16   : > { %916 = vmatpush3.bf16.msra.mxu1 %v1022_v5 }
  0x17   : > { %917 = vmatprep.subr.bf16.mxu1 %v1073_v1  ;;  %960 = vmatpush3.bf16.msra.mxu0 %v1030_v18  ;;  %v1032_v18 = vld [vmem:[%s1316_s2 + $0x60] sm:$0xff]  }
  0x18   : > { %890 = vmatmul.mubr.msk.bf16.gmra.mxu0 %vm264_vm1, %v1015_v6  ;;  %961 = vmatprep.subr.bf16.mxu0 %v1073_v1 }
  0x19   : > { %893 = vmatprep.mubr.msk.bf16.mxu0 %vm1074_vm0, %v1073_v1  ;;  %906 = vmatmul.mubr.msk.bf16.gmra.mxu1 %vm264_vm1, %v1019_v7 }
  0x1a   : > { %909 = vmatprep.mubr.msk.bf16.mxu1 %vm1074_vm0, %v1073_v1  ;;  %918 = vmatpush3.bf16.msra.mxu1 %v1023_v11 }
  0x1b   : > { %919 = vmatprep.subr.bf16.mxu1 %v1073_v1  ;;  %962 = vmatpush3.bf16.msra.mxu0 %v1031_v17 }
  0x1c   : > { %963 = vmatprep.subr.bf16.mxu0 %v1073_v1 }
  0x1e   : > { %920 = vmatpush3.bf16.msra.mxu1 %v1024_v12 }
  0x1f   : > { %921 = vmatprep.subr.bf16.mxu1 %v1073_v1  ;;  %964 = vmatpush3.bf16.msra.mxu0 %v1032_v18 }
  0x20   : > { %894 = vmatmul.mubr.msk.bf16.gmra.mxu0 %vm264_vm1, %v1016_v8  ;;  %965 = vmatprep.subr.bf16.mxu0 %v1073_v1 }
  0x21   : > { %897 = vmatprep.mubr.msk.bf16.mxu0 %vm1074_vm0, %v1073_v1  ;;  %910 = vmatmul.mubr.msk.bf16.gmra.mxu1 %vm264_vm1, %v1020_v9 }
  0x22   : > { %929 = vmatprep.mubr.msk.bf16.mxu1 %vm1074_vm0, %v1073_v1  ;;  %922 = vmatpush3.bf16.msra.mxu1 %v1025_v13 }
  0x23   : > { %923 = vmatprep.subr.bf16.mxu1 %v1073_v1  ;;  %966 = vmatpush3.bf16.msra.mxu0 %v1033_v19 }
  0x24   : > { %967 = vmatprep.subr.bf16.mxu0 %v1073_v1 }
  0x26   : > { %924 = vmatpush3.bf16.msra.mxu1 %v1026_v14 }
  0x27   : > { %925 = vmatprep.subr.bf16.mxu1 %v1073_v1  ;;  %968 = vmatpush3.bf16.msra.mxu0 %v1034_v21  ;;  %v579_v21 = vsub.s32 2, %v1185_v20 }
  0x28   : > { %898 = vmatmul.mubr.msk.bf16.gmra.mxu0 %vm264_vm1, %v1017_v10  ;;  %969 = vmatprep.subr.bf16.mxu0 %v1073_v1 }
  0x29   : > { %973 = vmatprep.mubr.msk.bf16.mxu0 %vm1074_vm0, %v1073_v1 }
  0x2a   : > { %926 = vmatpush3.bf16.msra.mxu1 %v1027_v15 }
  0x2b   : > { %927 = vmatprep.subr.bf16.mxu1 %v1073_v1 }
  0x2e   : > { %928 = vmatpush3.bf16.msra.mxu1 %v1028_v16 }
  0xd0   : > { %v320_v23 = vpop.f32.mrf.mxu0 }
  0xd1   : > { %v352_v27 = vpop.f32.mrf.mxu1  ;;  %v321_v28 = vadd.f32 %v320_v23, %v1194_v24  ;;  %v1035_v23 = vld [vmem:[%s1316_s2 + $0x48] sm:$0xff]  }
  0xd2   : > { %v887_v25 = vpop.f32.mrf.mxu0  ;;  %v353_v3 = vadd.f32 %v352_v27, %v1194_v24  ;;  %970 = vmatpush3.bf16.msra.mxu0 %v1035_v23  ;;  %v580_v23 = vrot.slane %v1191_v22, %v579_v21 }
  0xd3   : > { %v903_v31 = vpop.f32.mrf.mxu1  ;;  %971 = vmatprep.subr.bf16.mxu0 %v1073_v1  ;;  %v407_v25 = vsub.s32 1, %v1185_v20 }
  0xd4   : > { %v323_v26 = vpop.f32.mrf.mxu0 }
  0xd5   : > { %v324_v29 = vadd.f32 %v323_v26, %v1194_v24  ;;  %v355_v34 = vpop.f32.mrf.mxu1  ;;  %v1247_v27 = vrot.slane %v1191_v22, %v407_v25 }
  0xd6   : > { %v888_v30 = vpop.f32.mrf.mxu0  ;;  %v356_v4 = vadd.f32 %v355_v34, %v1194_v24 }
  0xd7   : > { %v375_v32 = vpack.c.bf16 %v324_v29, %v321_v28  ;;  %v904_v36 = vpop.f32.mrf.mxu1 }
  0xd8   : > { %v328_v33 = vpop.f32.mrf.mxu0  ;;  %v379_v5 = vpack.c.bf16 %v356_v4, %v353_v3 }
  0xd9   : > { %1037 = vtanh.bf16 %v375_v32  ;;  %v360_v38 = vpop.f32.mrf.mxu1  ;;  %v329_v39 = vadd.f32 %v328_v33, %v1194_v24 }
  0xda   : > { %v891_v35 = vpop.f32.mrf.mxu0  ;;  %v361_v7 = vadd.f32 %v360_v38, %v1194_v24 }
  0xdb   : > { %v907_v42 = vpop.f32.mrf.mxu1 }
  0xdc   : > { %v331_v37 = vpop.f32.mrf.mxu0 }
  0xdd   : > { %v332_v40 = vadd.f32 %v331_v37, %v1194_v24  ;;  %v363_v45 = vpop.f32.mrf.mxu1 }
  0xde   : > { %v892_v41 = vpop.f32.mrf.mxu0  ;;  %v364_v8 = vadd.f32 %v363_v45, %v1194_v24 }
  0xdf   : > { %v376_v43 = vpack.c.bf16 %v332_v40, %v329_v39  ;;  %v908_v47 = vpop.f32.mrf.mxu1 }
  0xe0   : > { %v336_v44 = vpop.f32.mrf.mxu0  ;;  %v380_v9 = vpack.c.bf16 %v364_v8, %v361_v7 }
  0xe1   : > { %1039 = vtanh.bf16 %v376_v43  ;;  %v368_v49 = vpop.f32.mrf.mxu1  ;;  %v337_v50 = vadd.f32 %v336_v44, %v1194_v24 }
  0xe2   : > { %v895_v46 = vpop.f32.mrf.mxu0  ;;  %v369_v11 = vadd.f32 %v368_v49, %v1194_v24 }
  0xe3   : > { %v911_v53 = vpop.f32.mrf.mxu1 }
  0xe4   : > { %v339_v48 = vpop.f32.mrf.mxu0 }
  0xe5   : > { %v340_v51 = vadd.f32 %v339_v48, %v1194_v24  ;;  %v371_v57 = vpop.f32.mrf.mxu1 }
  0xe6   : > { %v896_v52 = vpop.f32.mrf.mxu0  ;;  %v372_v12 = vadd.f32 %v371_v57, %v1194_v24 }
  0xe7   : > { %v1038_v54 = vpop.eup %1037  ;;  %v377_v55 = vpack.c.bf16 %v340_v51, %v337_v50  ;;  %v912_v59 = vpop.f32.mrf.mxu1 }
  0xe8   : > { %v344_v56 = vpop.f32.mrf.mxu0  ;;  %930 = vmatmul.mubr.bf16.vlgmr.msra.gmra.mxu1 %v1038_v54  ;;  %v381_v13 = vpack.c.bf16 %v372_v12, %v369_v11 }
  0xe9   : > { %1041 = vtanh.bf16 %v377_v55  ;;  %933 = vmatprep.mubr.msk.bf16.mxu1 %vm1074_vm0, %v1073_v1  ;;  %v345_v61 = vadd.f32 %v344_v56, %v1194_v24 }
  0xea   : > { %v899_v58 = vpop.f32.mrf.mxu0 }
  0xec   : > { %v347_v60 = vpop.f32.mrf.mxu0 }
  0xed   : > { %v348_v62 = vadd.f32 %v347_v60, %v1194_v24  ;;  %v1036_v24 = vld [vmem:[%s1316_s2 + $0x40] sm:$0xff]  }
  0xee   : > { %v900_v63 = vpop.f32.mrf.mxu0  ;;  %972 = vmatpush3.bf16.msra.mxu0 %v1036_v24 }
  0xef   : > { %v1040_v0 = vpop.eup %1039  ;;  %v378_v2 = vpack.c.bf16 %v348_v62, %v345_v61 }
  0xf0   : > { %934 = vmatmul.mubr.bf16.gmra.mxu1 %v1040_v0 }
  0xf1   : > { %1043 = vtanh.bf16 %v378_v2  ;;  %937 = vmatprep.mubr.msk.bf16.mxu1 %vm1074_vm0, %v1073_v1 }
  0xf2   : > { %1045 = vtanh.bf16 %v379_v5 }
  0xf3   : > { %1047 = vtanh.bf16 %v380_v9 }
  0xf4   : > { %1049 = vtanh.bf16 %v381_v13 }
  0xf7   : > { %v1042_v6 = vpop.eup %1041 }
  0xf8   : > { %938 = vmatmul.mubr.bf16.gmra.mxu1 %v1042_v6 }
  0xf9   : > { %941 = vmatprep.mubr.msk.bf16.mxu1 %vm1074_vm0, %v1073_v1 }
  0xff   : > { %v1044_v10 = vpop.eup %1043 }
 0x100   : > { %942 = vmatmul.mubr.bf16.gmra.mxu1 %v1044_v10  ;;  %v1046_v14 = vpop.eup %1045 }
 0x101   : > { %945 = vmatprep.mubr.msk.bf16.mxu1 %vm1074_vm0, %v1073_v1  ;;  %v1048_v15 = vpop.eup %1047 }
 0x102   : > { %v1050_v16 = vpop.eup %1049 }
 0x108   : > { %946 = vmatmul.mubr.bf16.gmra.mxu1 %v1046_v14 }
 0x109   : > { %949 = vmatprep.mubr.msk.bf16.mxu1 %vm1074_vm0, %v1073_v1 }
 0x110   : > { %950 = vmatmul.mubr.bf16.gmra.mxu1 %v1048_v15 }
 0x111   : > { %953 = vmatprep.mubr.msk.bf16.mxu1 %vm1074_vm0, %v1073_v1 }
 0x118   : > { %954 = vmatmul.mubr.bf16.gmra.mxu1 %v1050_v16 }
 0x1a8   : > { %v491_v26 = vpop.f32.mrf.mxu1 }
 0x1a9   : > { %v492_v30 = vadd.f32 %v491_v26, %v1247_v27 }
 0x1aa   : > { %v931_v28 = vpop.f32.mrf.mxu1 }
 0x1ac   : > { %v494_v29 = vpop.f32.mrf.mxu1 }
 0x1ad   : > { %v495_v31 = vadd.f32 %v494_v29, %v1247_v27 }
 0x1ae   : > { %v932_v32 = vpop.f32.mrf.mxu1 }
 0x1af   : > { %v546_v33 = vpack.c.bf16 %v495_v31, %v492_v30 }
 0x1b0   : > { %v499_v34 = vpop.f32.mrf.mxu1 }
 0x1b1   : > { %1051 = vtanh.bf16 %v546_v33  ;;  %v500_v37 = vadd.f32 %v499_v34, %v1247_v27 }
 0x1b2   : > { %v935_v35 = vpop.f32.mrf.mxu1 }
 0x1b4   : > { %v502_v36 = vpop.f32.mrf.mxu1 }
 0x1b5   : > { %v503_v38 = vadd.f32 %v502_v36, %v1247_v27 }
 0x1b6   : > { %v936_v39 = vpop.f32.mrf.mxu1 }
 0x1b7   : > { %v547_v40 = vpack.c.bf16 %v503_v38, %v500_v37 }
 0x1b8   : > { %v507_v41 = vpop.f32.mrf.mxu1 }
 0x1b9   : > { %1053 = vtanh.bf16 %v547_v40  ;;  %v508_v44 = vadd.f32 %v507_v41, %v1247_v27 }
 0x1ba   : > { %v939_v42 = vpop.f32.mrf.mxu1 }
 0x1bc   : > { %v510_v43 = vpop.f32.mrf.mxu1 }
 0x1bd   : > { %v511_v45 = vadd.f32 %v510_v43, %v1247_v27 }
 0x1be   : > { %v940_v46 = vpop.f32.mrf.mxu1 }
 0x1bf   : > { %v1052_v47 = vpop.eup %1051  ;;  %v548_v48 = vpack.c.bf16 %v511_v45, %v508_v44 }
 0x1c0   : > { %v515_v49 = vpop.f32.mrf.mxu1  ;;  %974 = vmatmul.mubr.bf16.vlgmr.msra.gmra.mxu0 %v1052_v47 }
 0x1c1   : > { %1055 = vtanh.bf16 %v548_v48  ;;  %977 = vmatprep.mubr.msk.bf16.mxu0 %vm1074_vm0, %v1073_v1  ;;  %v516_v52 = vadd.f32 %v515_v49, %v1247_v27 }
 0x1c2   : > { %v943_v50 = vpop.f32.mrf.mxu1 }
 0x1c4   : > { %v518_v51 = vpop.f32.mrf.mxu1 }
 0x1c5   : > { %v519_v53 = vadd.f32 %v518_v51, %v1247_v27 }
 0x1c6   : > { %v944_v54 = vpop.f32.mrf.mxu1 }
 0x1c7   : > { %v1054_v55 = vpop.eup %1053  ;;  %v549_v56 = vpack.c.bf16 %v519_v53, %v516_v52 }
 0x1c8   : > { %v523_v57 = vpop.f32.mrf.mxu1  ;;  %978 = vmatmul.mubr.bf16.gmra.mxu0 %v1054_v55 }
 0x1c9   : > { %1057 = vtanh.bf16 %v549_v56  ;;  %981 = vmatprep.mubr.msk.bf16.mxu0 %vm1074_vm0, %v1073_v1  ;;  %v524_v60 = vadd.f32 %v523_v57, %v1247_v27 }
 0x1ca   : > { %v947_v58 = vpop.f32.mrf.mxu1 }
 0x1cc   : > { %v526_v59 = vpop.f32.mrf.mxu1 }
 0x1cd   : > { %v527_v61 = vadd.f32 %v526_v59, %v1247_v27 }
 0x1ce   : > { %v948_v62 = vpop.f32.mrf.mxu1 }
 0x1cf   : > { %v1056_v63 = vpop.eup %1055  ;;  %v550_v0 = vpack.c.bf16 %v527_v61, %v524_v60 }
 0x1d0   : > { %v531_v2 = vpop.f32.mrf.mxu1  ;;  %982 = vmatmul.mubr.bf16.gmra.mxu0 %v1056_v63 }
 0x1d1   : > { %1059 = vtanh.bf16 %v550_v0  ;;  %985 = vmatprep.mubr.msk.bf16.mxu0 %vm1074_vm0, %v1073_v1  ;;  %v532_v5 = vadd.f32 %v531_v2, %v1247_v27 }
 0x1d2   : > { %v951_v3 = vpop.f32.mrf.mxu1 }
 0x1d4   : > { %v534_v4 = vpop.f32.mrf.mxu1 }
 0x1d5   : > { %v535_v6 = vadd.f32 %v534_v4, %v1247_v27 }
 0x1d6   : > { %v952_v7 = vpop.f32.mrf.mxu1 }
 0x1d7   : > { %v1058_v8 = vpop.eup %1057  ;;  %v551_v9 = vpack.c.bf16 %v535_v6, %v532_v5 }
 0x1d8   : > { %v539_v10 = vpop.f32.mrf.mxu1  ;;  %986 = vmatmul.mubr.bf16.gmra.mxu0 %v1058_v8 }
 0x1d9   : > { %1061 = vtanh.bf16 %v551_v9  ;;  %989 = vmatprep.mubr.msk.bf16.mxu0 %vm1074_vm0, %v1073_v1  ;;  %v540_v13 = vadd.f32 %v539_v10, %v1247_v27 }
 0x1da   : > { %v955_v11 = vpop.f32.mrf.mxu1 }
 0x1dc   : > { %v542_v12 = vpop.f32.mrf.mxu1 }
 0x1dd   : > { %v543_v14 = vadd.f32 %v542_v12, %v1247_v27 }
 0x1de   : > { %v956_v15 = vpop.f32.mrf.mxu1 }
 0x1df   : > { %v1060_v16 = vpop.eup %1059  ;;  %v552_v17 = vpack.c.bf16 %v543_v14, %v540_v13 }
 0x1e0   : > { %990 = vmatmul.mubr.bf16.gmra.mxu0 %v1060_v16 }
 0x1e1   : > { %1063 = vtanh.bf16 %v552_v17  ;;  %993 = vmatprep.mubr.msk.bf16.mxu0 %vm1074_vm0, %v1073_v1 }
 0x1e7   : > { %v1062_v18 = vpop.eup %1061 }
 0x1e8   : > { %994 = vmatmul.mubr.bf16.gmra.mxu0 %v1062_v18 }
 0x1e9   : > { %997 = vmatprep.mubr.msk.bf16.mxu0 %vm1074_vm0, %v1073_v1 }
 0x1ef   : > { %v1064_v19 = vpop.eup %1063 }
 0x1f0   : > { %998 = vmatmul.mubr.bf16.gmra.mxu0 %v1064_v19 }
 0x280   : > { %v663_v24 = vpop.f32.mrf.mxu0 }
 0x281   : > { %v664_v25 = vadd.f32 %v663_v24, %v580_v23 }
 0x282   : > { %v975_v1 = vpop.f32.mrf.mxu0 }
 0x283   : > { %719 = vst.msk [vmem:[%s1281_s11] sm:$0xff] %vm718_vm2, %v664_v25 }
 0x284   : > { %v666_v20 = vpop.f32.mrf.mxu0 }
 0x285   : > { %v667_v26 = vadd.f32 %v666_v20, %v580_v23 }
 0x286   : > { %v976_v27 = vpop.f32.mrf.mxu0 }
 0x287   : > { %720 = vst.msk [vmem:[%s1281_s11 + $0x8] sm:$0xff] %vm718_vm2, %v667_v26 }
 0x288   : > { %v671_v22 = vpop.f32.mrf.mxu0 }
 0x289   : > { %v672_v28 = vadd.f32 %v671_v22, %v580_v23 }
 0x28a   : > { %v979_v29 = vpop.f32.mrf.mxu0 }
 0x28b   : > { %721 = vst.msk [vmem:[%s1281_s11 + $0x10] sm:$0xff] %vm718_vm2, %v672_v28 }
 0x28c   : > { %v674_v30 = vpop.f32.mrf.mxu0 }
 0x28d   : > { %v675_v31 = vadd.f32 %v674_v30, %v580_v23 }
 0x28e   : > { %v980_v32 = vpop.f32.mrf.mxu0 }
 0x28f   : > { %722 = vst.msk [vmem:[%s1281_s11 + $0x18] sm:$0xff] %vm718_vm2, %v675_v31 }
 0x290   : > { %v679_v33 = vpop.f32.mrf.mxu0 }
 0x291   : > { %v680_v34 = vadd.f32 %v679_v33, %v580_v23 }
 0x292   : > { %v983_v35 = vpop.f32.mrf.mxu0 }
 0x293   : > { %723 = vst.msk [vmem:[%s1281_s11 + $0x20] sm:$0xff] %vm718_vm2, %v680_v34 }
 0x294   : > { %v682_v36 = vpop.f32.mrf.mxu0 }
 0x295   : > { %v683_v37 = vadd.f32 %v682_v36, %v580_v23 }
 0x296   : > { %v984_v38 = vpop.f32.mrf.mxu0 }
 0x297   : > { %724 = vst.msk [vmem:[%s1281_s11 + $0x28] sm:$0xff] %vm718_vm2, %v683_v37 }
 0x298   : > { %v687_v39 = vpop.f32.mrf.mxu0 }
 0x299   : > { %v688_v40 = vadd.f32 %v687_v39, %v580_v23 }
 0x29a   : > { %v987_v41 = vpop.f32.mrf.mxu0 }
 0x29b   : > { %725 = vst.msk [vmem:[%s1281_s11 + $0x30] sm:$0xff] %vm718_vm2, %v688_v40 }
 0x29c   : > { %v690_v42 = vpop.f32.mrf.mxu0 }
 0x29d   : > { %v691_v43 = vadd.f32 %v690_v42, %v580_v23 }
 0x29e   : > { %v988_v44 = vpop.f32.mrf.mxu0 }
 0x29f   : > { %726 = vst.msk [vmem:[%s1281_s11 + $0x38] sm:$0xff] %vm718_vm2, %v691_v43 }
 0x2a0   : > { %v695_v45 = vpop.f32.mrf.mxu0 }
 0x2a1   : > { %v696_v46 = vadd.f32 %v695_v45, %v580_v23 }
 0x2a2   : > { %v991_v47 = vpop.f32.mrf.mxu0 }
 0x2a3   : > { %727 = vst.msk [vmem:[%s1281_s11 + $0x40] sm:$0xff] %vm718_vm2, %v696_v46 }
 0x2a4   : > { %v698_v48 = vpop.f32.mrf.mxu0 }
 0x2a5   : > { %v699_v49 = vadd.f32 %v698_v48, %v580_v23 }
 0x2a6   : > { %v992_v50 = vpop.f32.mrf.mxu0 }
 0x2a7   : > { %728 = vst.msk [vmem:[%s1281_s11 + $0x48] sm:$0xff] %vm718_vm2, %v699_v49 }
 0x2a8   : > { %v703_v51 = vpop.f32.mrf.mxu0 }
 0x2a9   : > { %v704_v52 = vadd.f32 %v703_v51, %v580_v23 }
 0x2aa   : > { %v995_v53 = vpop.f32.mrf.mxu0 }
 0x2ab   : > { %729 = vst.msk [vmem:[%s1281_s11 + $0x50] sm:$0xff] %vm718_vm2, %v704_v52 }
 0x2ac   : > { %v706_v54 = vpop.f32.mrf.mxu0 }
 0x2ad   : > { %v707_v55 = vadd.f32 %v706_v54, %v580_v23 }
 0x2ae   : > { %v996_v56 = vpop.f32.mrf.mxu0 }
 0x2af   : > { %730 = vst.msk [vmem:[%s1281_s11 + $0x58] sm:$0xff] %vm718_vm2, %v707_v55 }
 0x2b0   : > { %v711_v57 = vpop.f32.mrf.mxu0 }
 0x2b1   : > { %v712_v58 = vadd.f32 %v711_v57, %v580_v23 }
 0x2b2   : > { %v999_v59 = vpop.f32.mrf.mxu0 }
 0x2b3   : > { %731 = vst.msk [vmem:[%s1281_s11 + $0x60] sm:$0xff] %vm718_vm2, %v712_v58 }
 0x2b4   : > { %v714_v60 = vpop.f32.mrf.mxu0 }
 0x2b5   : > { %v715_v61 = vadd.f32 %v714_v60, %v580_v23 }
 0x2b6   : > { %v1000_v62 = vpop.f32.mrf.mxu0 }
 0x2b7   : > { %732 = vst.msk [vmem:[%s1281_s11 + $0x68] sm:$0xff] %vm718_vm2, %v715_v61 }
 0x2b8 PF: > { %s14_s15 = sadd.s32 1, %s1071_s15  }
 0x2b9   : > { %p11_p4 = scmp.ge.s32.totalorder %s14_s15, 4  }
 0x2bb   :  { %13 = sbr.rel (!%p11_p4) target bundleno = 1 (0x1), region = 67 }

</bundles_post_ra>
